<compile_context>
chip_gen: v7x
topology: tpu7x:2x2x1
jax: 0.10.0
libtpu: 0.0.40
codegen_flags: <defaults>
</compile_context>

<pallas_src>
import jax
import jax.numpy as jnp
from jax.experimental import pallas as pl
from jax.experimental.pallas import tpu as pltpu

EPS = 1e-5

# Fixed trunk dims from the PyTorch module.
H1, H2, H3 = 512, 128, 32
LANES = 128  # padded lane width for layers 2/3/head


def _kernel(x_ref, w1_ref, wpack_ref, vec_ref, out_ref):
    """Fused 3x(Linear+BN(train)+ReLU) + sigmoid head, single grid point."""

    def bn_relu(z, gamma, beta):
        # Single-pass batch statistics (biased variance), folded scale/shift.
        mean = jnp.mean(z, axis=0, keepdims=True)
        var = jnp.mean(z * z, axis=0, keepdims=True) - mean * mean
        scale = gamma * jax.lax.rsqrt(var + EPS)
        shift = beta - mean * scale
        return jnp.maximum(z * scale + shift, 0.0)

    h = x_ref[...]

    # Layer 1: (B, D_in) @ (D_in, 512)
    z1 = jnp.dot(h, w1_ref[...], preferred_element_type=jnp.float32)
    h = bn_relu(z1, vec_ref[0:1, :], vec_ref[1:2, :])

    # Layer 2: (B, 512) @ (512, 128)
    z2 = jnp.dot(h, wpack_ref[0:H1, :], preferred_element_type=jnp.float32)
    h = bn_relu(z2, vec_ref[2:3, 0:LANES], vec_ref[3:4, 0:LANES])

    # Layer 3: (B, 128) @ (128, 128)  (cols 32..127 are zero padding; their
    # gamma/beta are zero so the padded activations are exactly 0 after ReLU).
    z3 = jnp.dot(h, wpack_ref[H1:H1 + LANES, :], preferred_element_type=jnp.float32)
    h = bn_relu(z3, vec_ref[4:5, 0:LANES], vec_ref[5:6, 0:LANES])

    # Head: (B, 128) @ (128, 128) + bias, sigmoid.  Padded rows/cols of the
    # head weight are zero, so cols 0..out-1 hold the real logits.
    logits = jnp.dot(h, wpack_ref[H1 + LANES:H1 + 2 * LANES, :],
                     preferred_element_type=jnp.float32)
    logits = logits + vec_ref[6:7, 0:LANES]
    out_ref[...] = 1.0 / (1.0 + jnp.exp(-logits))  # exact sigmoid


def pack_params(params, output_size):
    """Packs PyTorch-layout params into the 3 dense kernel inputs."""
    (w1, _b1, g1, be1), (w2, _b2, g2, be2), (w3, _b3, g3, be3) = params["trunk"]
    wh, bh = params["head"]

    # Weight slab: [w2 (512,128) ; w3 padded (128,128) ; head padded (128,128)]
    w3p = jnp.zeros((LANES, LANES), jnp.float32).at[:, :H3].set(w3)
    whp = jnp.zeros((LANES, LANES), jnp.float32).at[:H3, :output_size].set(wh)
    wpack = jnp.concatenate([w2, w3p, whp], axis=0)  # (768, 128)

    # Vector slab: (8, 512) — gamma/beta for BN1..3 (zero-padded) + head bias.
    vecs = jnp.zeros((8, H1), jnp.float32)
    vecs = vecs.at[0, :H1].set(g1)
    vecs = vecs.at[1, :H1].set(be1)
    vecs = vecs.at[2, :H2].set(g2)
    vecs = vecs.at[3, :H2].set(be2)
    vecs = vecs.at[4, :H3].set(g3)
    vecs = vecs.at[5, :H3].set(be3)
    vecs = vecs.at[6, :output_size].set(bh)
    # NOTE: trunk Linear biases intentionally omitted — they cancel exactly
    # under the BN batch-mean subtraction.
    return w1, wpack, vecs


def small_ffnn_forward(x, packed, output_size):
    """Runs the fused forward pass; returns (batch, output_size) probabilities."""
    w1, wpack, vecs = packed
    batch = x.shape[0]
    out_pad = pl.pallas_call(
        _kernel,
        out_shape=jax.ShapeDtypeStruct((batch, LANES), jnp.float32),
        # Tiny model: everything fits in VMEM; single grid point, full blocks.
        in_specs=[pl.BlockSpec(memory_space=pltpu.MemorySpace.VMEM)] * 4,
        out_specs=pl.BlockSpec(memory_space=pltpu.MemorySpace.VMEM),
    )(x, w1, wpack, vecs)
    return out_pad[:, :output_size]


def init_params(key, input_size, output_size):
    """Deterministic PyTorch-style (uniform +-1/sqrt(fan_in)) initialization."""

    def linear(key, fan_in, fan_out):
        kw, kb = jax.random.split(key)
        bound = 1.0 / jnp.sqrt(jnp.float32(fan_in))
        # Stored pre-transposed: [in, out] so the kernel does h @ W directly.
        w = jax.random.uniform(kw, (fan_in, fan_out), jnp.float32, -bound, bound)
        b = jax.random.uniform(kb, (fan_out,), jnp.float32, -bound, bound)
        return w, b

    dims = [input_size, H1, H2, H3]
    keys = jax.random.split(key, 4)

    trunk = []
    for i in range(3):
        w, b = linear(keys[i], dims[i], dims[i + 1])
        gamma = jnp.ones((dims[i + 1],), jnp.float32)
        beta = jnp.zeros((dims[i + 1],), jnp.float32)
        trunk.append((w, b, gamma, beta))

    head = linear(keys[3], H3, output_size)
    return {"trunk": trunk, "head": head}


def reference_forward(x, params):
    """Pure-JAX reference mirroring the PyTorch module (training-mode BN)."""
    h = x
    for (w, b, g, be) in params["trunk"]:
        z = h @ w + b
        mean = jnp.mean(z, axis=0, keepdims=True)
        var = jnp.mean((z - mean) ** 2, axis=0, keepdims=True)
        h = jnp.maximum((z - mean) / jnp.sqrt(var + EPS) * g + be, 0.0)
    wh, bh = params["head"]
    return jax.nn.sigmoid(h @ wh + bh)


if __name__ == "__main__":
    INPUT_SIZE = 64
    OUTPUT_SIZE = 10
    BATCH = 8

    key = jax.random.PRNGKey(0)
    kx, kp = jax.random.split(key)
    x = jax.random.normal(kx, (BATCH, INPUT_SIZE), jnp.float32)
    params = init_params(kp, INPUT_SIZE, OUTPUT_SIZE)
    packed = pack_params(params, OUTPUT_SIZE)

    out = small_ffnn_forward(x, packed, OUTPUT_SIZE)
    out = jax.block_until_ready(out)

    ref = reference_forward(x, params)
    assert out.shape == (BATCH, OUTPUT_SIZE) and out.dtype == jnp.float32
    if not jnp.allclose(out, ref, atol=1e-4, rtol=1e-4):
        raise AssertionError("Pallas output mismatch vs reference")

    print("KERNEL_OK")
</pallas_src>

<mosaic_0001>
module attributes {stable_mosaic.version = 11 : i64} {
  func.func @_kernel(%arg0: memref<8x64xf32, #tpu.memory_space<vmem>>, %arg1: memref<64x512xf32, #tpu.memory_space<vmem>>, %arg2: memref<768x128xf32, #tpu.memory_space<vmem>>, %arg3: memref<8x512xf32, #tpu.memory_space<vmem>>, %arg4: memref<8x128xf32, #tpu.memory_space<vmem>>) attributes {dimension_semantics = [], scalar_prefetch = 0 : i64, scratch_operands = 0 : i64, tpu.core_type = #tpu.core_type<tc>} {
    %c0 = arith.constant 0 : index
    %c0_0 = arith.constant 0 : index
    %0 = vector.load %arg0[%c0, %c0_0] : memref<8x64xf32, #tpu.memory_space<vmem>>, vector<8x64xf32>
    %c0_1 = arith.constant 0 : index
    %c0_2 = arith.constant 0 : index
    %1 = vector.load %arg1[%c0_1, %c0_2] : memref<64x512xf32, #tpu.memory_space<vmem>>, vector<64x512xf32>
    %cst = arith.constant dense<0.000000e+00> : vector<8x512xf32>
    %2 = tpu.matmul %0, %1, %cst {dimension_numbers = #tpu.dot_dimension_numbers<[1], [0], [0], [1], [0, 0, 1, 1], [], []>} : vector<8x64xf32>, vector<64x512xf32>, vector<8x512xf32> -> vector<8x512xf32>
    %c0_3 = arith.constant 0 : index
    %c0_4 = arith.constant 0 : index
    %3 = vector.load %arg3[%c0_3, %c0_4] : memref<8x512xf32, #tpu.memory_space<vmem>>, vector<1x512xf32>
    %c1 = arith.constant 1 : index
    %c0_5 = arith.constant 0 : index
    %4 = vector.load %arg3[%c1, %c0_5] : memref<8x512xf32, #tpu.memory_space<vmem>>, vector<1x512xf32>
    %cst_6 = arith.constant dense<0.000000e+00> : vector<512xf32>
    %5 = vector.multi_reduction <add>, %2, %cst_6 [0] : vector<8x512xf32> to vector<512xf32>
    %6 = vector.shape_cast %5 : vector<512xf32> to vector<1x512xf32>
    %cst_7 = arith.constant 8.000000e+00 : f32
    %7 = vector.broadcast %cst_7 : f32 to vector<1x512xf32>
    %8 = arith.divf %6, %7 : vector<1x512xf32>
    %9 = arith.mulf %2, %2 : vector<8x512xf32>
    %cst_8 = arith.constant dense<0.000000e+00> : vector<512xf32>
    %10 = vector.multi_reduction <add>, %9, %cst_8 [0] : vector<8x512xf32> to vector<512xf32>
    %11 = vector.shape_cast %10 : vector<512xf32> to vector<1x512xf32>
    %cst_9 = arith.constant 8.000000e+00 : f32
    %12 = vector.broadcast %cst_9 : f32 to vector<1x512xf32>
    %13 = arith.divf %11, %12 : vector<1x512xf32>
    %14 = arith.mulf %8, %8 : vector<1x512xf32>
    %15 = arith.subf %13, %14 : vector<1x512xf32>
    %cst_10 = arith.constant 9.99999974E-6 : f32
    %16 = vector.broadcast %cst_10 : f32 to vector<1x512xf32>
    %17 = arith.addf %15, %16 : vector<1x512xf32>
    %18 = math.rsqrt %17 : vector<1x512xf32>
    %19 = arith.mulf %3, %18 : vector<1x512xf32>
    %20 = arith.mulf %8, %19 : vector<1x512xf32>
    %21 = arith.subf %4, %20 : vector<1x512xf32>
    %22 = vector.broadcast %19 : vector<1x512xf32> to vector<8x512xf32>
    %23 = arith.mulf %2, %22 : vector<8x512xf32>
    %24 = vector.broadcast %21 : vector<1x512xf32> to vector<8x512xf32>
    %25 = arith.addf %23, %24 : vector<8x512xf32>
    %cst_11 = arith.constant 0.000000e+00 : f32
    %26 = vector.broadcast %cst_11 : f32 to vector<8x512xf32>
    %27 = arith.maximumf %25, %26 : vector<8x512xf32>
    %c0_12 = arith.constant 0 : index
    %c0_13 = arith.constant 0 : index
    %28 = vector.load %arg2[%c0_12, %c0_13] : memref<768x128xf32, #tpu.memory_space<vmem>>, vector<512x128xf32>
    %cst_14 = arith.constant dense<0.000000e+00> : vector<8x128xf32>
    %29 = tpu.matmul %27, %28, %cst_14 {dimension_numbers = #tpu.dot_dimension_numbers<[1], [0], [0], [1], [0, 0, 1, 1], [], []>} : vector<8x512xf32>, vector<512x128xf32>, vector<8x128xf32> -> vector<8x128xf32>
    %c2 = arith.constant 2 : index
    %c0_15 = arith.constant 0 : index
    %30 = vector.load %arg3[%c2, %c0_15] : memref<8x512xf32, #tpu.memory_space<vmem>>, vector<1x128xf32>
    %c3 = arith.constant 3 : index
    %c0_16 = arith.constant 0 : index
    %31 = vector.load %arg3[%c3, %c0_16] : memref<8x512xf32, #tpu.memory_space<vmem>>, vector<1x128xf32>
    %cst_17 = arith.constant dense<0.000000e+00> : vector<128xf32>
    %32 = vector.multi_reduction <add>, %29, %cst_17 [0] : vector<8x128xf32> to vector<128xf32>
    %33 = vector.shape_cast %32 : vector<128xf32> to vector<1x128xf32>
    %cst_18 = arith.constant 8.000000e+00 : f32
    %34 = vector.broadcast %cst_18 : f32 to vector<1x128xf32>
    %35 = arith.divf %33, %34 : vector<1x128xf32>
    %36 = arith.mulf %29, %29 : vector<8x128xf32>
    %cst_19 = arith.constant dense<0.000000e+00> : vector<128xf32>
    %37 = vector.multi_reduction <add>, %36, %cst_19 [0] : vector<8x128xf32> to vector<128xf32>
    %38 = vector.shape_cast %37 : vector<128xf32> to vector<1x128xf32>
    %cst_20 = arith.constant 8.000000e+00 : f32
    %39 = vector.broadcast %cst_20 : f32 to vector<1x128xf32>
    %40 = arith.divf %38, %39 : vector<1x128xf32>
    %41 = arith.mulf %35, %35 : vector<1x128xf32>
    %42 = arith.subf %40, %41 : vector<1x128xf32>
    %cst_21 = arith.constant 9.99999974E-6 : f32
    %43 = vector.broadcast %cst_21 : f32 to vector<1x128xf32>
    %44 = arith.addf %42, %43 : vector<1x128xf32>
    %45 = math.rsqrt %44 : vector<1x128xf32>
    %46 = arith.mulf %30, %45 : vector<1x128xf32>
    %47 = arith.mulf %35, %46 : vector<1x128xf32>
    %48 = arith.subf %31, %47 : vector<1x128xf32>
    %49 = vector.broadcast %46 : vector<1x128xf32> to vector<8x128xf32>
    %50 = arith.mulf %29, %49 : vector<8x128xf32>
    %51 = vector.broadcast %48 : vector<1x128xf32> to vector<8x128xf32>
    %52 = arith.addf %50, %51 : vector<8x128xf32>
    %cst_22 = arith.constant 0.000000e+00 : f32
    %53 = vector.broadcast %cst_22 : f32 to vector<8x128xf32>
    %54 = arith.maximumf %52, %53 : vector<8x128xf32>
    %c512 = arith.constant 512 : index
    %c0_23 = arith.constant 0 : index
    %55 = vector.load %arg2[%c512, %c0_23] : memref<768x128xf32, #tpu.memory_space<vmem>>, vector<128x128xf32>
    %cst_24 = arith.constant dense<0.000000e+00> : vector<8x128xf32>
    %56 = tpu.matmul %54, %55, %cst_24 {dimension_numbers = #tpu.dot_dimension_numbers<[1], [0], [0], [1], [0, 0, 1, 1], [], []>} : vector<8x128xf32>, vector<128x128xf32>, vector<8x128xf32> -> vector<8x128xf32>
    %c4 = arith.constant 4 : index
    %c0_25 = arith.constant 0 : index
    %57 = vector.load %arg3[%c4, %c0_25] : memref<8x512xf32, #tpu.memory_space<vmem>>, vector<1x128xf32>
    %c5 = arith.constant 5 : index
    %c0_26 = arith.constant 0 : index
    %58 = vector.load %arg3[%c5, %c0_26] : memref<8x512xf32, #tpu.memory_space<vmem>>, vector<1x128xf32>
    %cst_27 = arith.constant dense<0.000000e+00> : vector<128xf32>
    %59 = vector.multi_reduction <add>, %56, %cst_27 [0] : vector<8x128xf32> to vector<128xf32>
    %60 = vector.shape_cast %59 : vector<128xf32> to vector<1x128xf32>
    %cst_28 = arith.constant 8.000000e+00 : f32
    %61 = vector.broadcast %cst_28 : f32 to vector<1x128xf32>
    %62 = arith.divf %60, %61 : vector<1x128xf32>
    %63 = arith.mulf %56, %56 : vector<8x128xf32>
    %cst_29 = arith.constant dense<0.000000e+00> : vector<128xf32>
    %64 = vector.multi_reduction <add>, %63, %cst_29 [0] : vector<8x128xf32> to vector<128xf32>
    %65 = vector.shape_cast %64 : vector<128xf32> to vector<1x128xf32>
    %cst_30 = arith.constant 8.000000e+00 : f32
    %66 = vector.broadcast %cst_30 : f32 to vector<1x128xf32>
    %67 = arith.divf %65, %66 : vector<1x128xf32>
    %68 = arith.mulf %62, %62 : vector<1x128xf32>
    %69 = arith.subf %67, %68 : vector<1x128xf32>
    %cst_31 = arith.constant 9.99999974E-6 : f32
    %70 = vector.broadcast %cst_31 : f32 to vector<1x128xf32>
    %71 = arith.addf %69, %70 : vector<1x128xf32>
    %72 = math.rsqrt %71 : vector<1x128xf32>
    %73 = arith.mulf %57, %72 : vector<1x128xf32>
    %74 = arith.mulf %62, %73 : vector<1x128xf32>
    %75 = arith.subf %58, %74 : vector<1x128xf32>
    %76 = vector.broadcast %73 : vector<1x128xf32> to vector<8x128xf32>
    %77 = arith.mulf %56, %76 : vector<8x128xf32>
    %78 = vector.broadcast %75 : vector<1x128xf32> to vector<8x128xf32>
    %79 = arith.addf %77, %78 : vector<8x128xf32>
    %cst_32 = arith.constant 0.000000e+00 : f32
    %80 = vector.broadcast %cst_32 : f32 to vector<8x128xf32>
    %81 = arith.maximumf %79, %80 : vector<8x128xf32>
    %c640 = arith.constant 640 : index
    %c0_33 = arith.constant 0 : index
    %82 = vector.load %arg2[%c640, %c0_33] : memref<768x128xf32, #tpu.memory_space<vmem>>, vector<128x128xf32>
    %cst_34 = arith.constant dense<0.000000e+00> : vector<8x128xf32>
    %83 = tpu.matmul %81, %82, %cst_34 {dimension_numbers = #tpu.dot_dimension_numbers<[1], [0], [0], [1], [0, 0, 1, 1], [], []>} : vector<8x128xf32>, vector<128x128xf32>, vector<8x128xf32> -> vector<8x128xf32>
    %c6 = arith.constant 6 : index
    %c0_35 = arith.constant 0 : index
    %84 = vector.load %arg3[%c6, %c0_35] : memref<8x512xf32, #tpu.memory_space<vmem>>, vector<1x128xf32>
    %85 = vector.broadcast %84 : vector<1x128xf32> to vector<8x128xf32>
    %86 = arith.addf %83, %85 : vector<8x128xf32>
    %cst_36 = arith.constant 0.000000e+00 : f32
    %87 = vector.broadcast %cst_36 : f32 to vector<8x128xf32>
    %88 = arith.subf %87, %86 : vector<8x128xf32>
    %89 = math.exp %88 : vector<8x128xf32>
    %cst_37 = arith.constant 1.000000e+00 : f32
    %90 = vector.broadcast %cst_37 : f32 to vector<8x128xf32>
    %91 = arith.addf %90, %89 : vector<8x128xf32>
    %cst_38 = arith.constant 1.000000e+00 : f32
    %92 = vector.broadcast %cst_38 : f32 to vector<8x128xf32>
    %93 = arith.divf %92, %91 : vector<8x128xf32>
    %c0_39 = arith.constant 0 : index
    %c0_40 = arith.constant 0 : index
    %94 = vector.load %arg4[%c0_39, %c0_40] : memref<8x128xf32, #tpu.memory_space<vmem>>, vector<8x128xf32>
    tpu.vector_store %arg4[%c0_39, %c0_40], %93 {strides = array<i32>} : memref<8x128xf32, #tpu.memory_space<vmem>>, vector<8x128xf32>,
    return
  }
}

</mosaic_0001>

<bundles_post_ra>
// kernel: tpu_custom_call.1
= control target key start
LH: loop header
LB: loop body
LE: loop exit
PB: predicated region body
PF: predicated region fallthrough
CT: control target
= control target key end

     0   :  { %9 = vsyncpa [#allocation3], 0  ;;  %s1514_s0 = inlined_call_operand.hbm [shape: f32[8,64], index: 0, kind: input, shape index: {}]   ;;  %s1515_s1 = inlined_call_operand.hbm [shape: f32[64,512], index: 1, kind: input, shape index: {}]   ;;  %s1516_s2 = inlined_call_operand.hbm [shape: f32[768,128], index: 2, kind: input, shape index: {}]   ;;  %s1517_s3 = inlined_call_operand.hbm [shape: f32[8,512], index: 3, kind: input, shape index: {}]   ;;  %s1518_s4 = inlined_call_operand.hbm [shape: f32[8,128], index: 4, kind: output, shape index: {}]  }
   0x1   :  { %10 = vsyncpa [#allocation6], 0 }
   0x2   :  { %11 = vsyncpa [#allocation9], 0 }
   0x3   :  { %12 = vsyncpa [#allocation4], 0  ;;  %s1368_s15 = smov [#allocation5]   ;;  %s1250_s19 = scalar_lea.hbm %s1515_s1, 4096 }
   0x4   :  { %s28_s16 = sshll.u32 %s1368_s15, 4  ;;  %p1251_p0 = scmp.ne.s32.totalorder %s1515_s1, %s1250_s19  ;;  %s29_s16 = int_to_ptr.vmem [resolvable:$true] %s28_s16 }
   0x5   :  { %p1254_p1 = scmp.lt.u32.totalorder %s1250_s19, %s1515_s1 }
   0x7   :  { %p1256_p2 = pnand %p1254_p1, %p1251_p0 }
   0x9   :  { %1259 = shalt.err (!%p1256_p2)
}
   0xa   :  { %s1260_s24 = scalar_lea.vmem %s29_s16, 4096  ;;  %p1265_p4 = scmp.lt.s32.totalorder %s29_s16, %s29_s16 }
   0xb   :  { %p1261_p3 = scmp.ne.s32.totalorder %s29_s16, %s1260_s24  ;;  %p1266_p5 = scmp.lt.s32.totalorder %s1260_s24, %s1260_s24 }
   0xd   :  { %p1267_p6 = por %p1266_p5, %p1265_p4 }
   0xf   :  { %p1268_p7 = pnand %p1267_p6, %p1261_p3 }
  0x11   :  { %1271 = shalt.err (!%p1268_p7)
}
  0x12   :  { %s1369_s25 = smov 512   ;;  %s1370_s26 = smov 32  }
  0x13   :  { %34 = dma.hbm_to_vmem [thread:$0]  %s1515_s1, 4096, %s29_s16, [#allocation6], %s1369_s25, %s1369_s25, %s1370_s26  }
  0x14   :  { %s1371_s29 = smov [#allocation2]   ;;  %s1372_s5 = smov [#allocation7]  }
  0x15   :  { %s19_s30 = sshll.u32 %s1371_s29, 4  ;;  %s40_s6 = sshll.u32 %s1372_s5, 4  ;;  %s20_s30 = int_to_ptr.vmem [resolvable:$true] %s19_s30  ;;  %s41_s6 = int_to_ptr.vmem [resolvable:$true] %s40_s6 }
  0x16   :  { %s1272_s9 = scalar_lea.hbm %s1514_s0, 128 }
  0x17   :  { %p1273_p8 = scmp.ne.s32.totalorder %s1514_s0, %s1272_s9  ;;  %p1276_p9 = scmp.lt.u32.totalorder %s1272_s9, %s1514_s0 }
  0x19   :  { %p1278_p10 = pnand %p1276_p9, %p1273_p8 }
  0x1b   :  { %1281 = shalt.err (!%p1278_p10)
}
  0x1c   :  { %s1282_s1 = scalar_lea.vmem %s20_s30, 128  ;;  %p1287_p12 = scmp.lt.s32.totalorder %s20_s30, %s20_s30 }
  0x1d   :  { %p1283_p11 = scmp.ne.s32.totalorder %s20_s30, %s1282_s1  ;;  %p1288_p13 = scmp.lt.s32.totalorder %s1282_s1, %s1282_s1 }
  0x1f   :  { %p1289_p0 = por %p1288_p13, %p1287_p12 }
  0x21   :  { %p1290_p1 = pnand %p1289_p0, %p1283_p11 }
  0x23   :  { %1293 = shalt.err (!%p1290_p1)
}
  0x24   :  { %22 = dma.hbm_to_vmem [thread:$0]  %s1514_s0, 128, %s20_s30, [#allocation3]  }
  0x25   :  { %s1294_s18 = scalar_lea.hbm %s1516_s2, 12288 }
  0x26   :  { %p1295_p2 = scmp.ne.s32.totalorder %s1516_s2, %s1294_s18  ;;  %p1298_p3 = scmp.lt.u32.totalorder %s1294_s18, %s1516_s2 }
  0x28   :  { %p1300_p4 = pnand %p1298_p3, %p1295_p2 }
  0x2a   :  { %1303 = shalt.err (!%p1300_p4)
}
  0x2b   :  { %s1304_s23 = scalar_lea.vmem %s41_s6, 12288  ;;  %p1309_p6 = scmp.lt.s32.totalorder %s41_s6, %s41_s6 }
  0x2c   :  { %p1305_p5 = scmp.ne.s32.totalorder %s41_s6, %s1304_s23  ;;  %p1310_p7 = scmp.lt.s32.totalorder %s1304_s23, %s1304_s23 }
  0x2e   :  { %p1311_p8 = por %p1310_p7, %p1309_p6 }
  0x30   :  { %p1312_p9 = pnand %p1311_p8, %p1305_p5 }
  0x32   :  { %1315 = shalt.err (!%p1312_p9)
}
  0x33   :  { %s1373_s0 = smov 128   ;;  %s1374_s24 = smov 8  }
  0x34   :  { %46 = dma.hbm_to_vmem [thread:$0]  %s1516_s2, 12288, %s41_s6, [#allocation6], %s1373_s0, %s1373_s0, %s1374_s24  }
  0x35   :  { %s1375_s27 = smov [#allocation8]   ;;  %s1316_s5 = scalar_lea.hbm %s1517_s3, 512 }
  0x36   :  { %s53_s28 = sshll.u32 %s1375_s27, 4  ;;  %p1317_p10 = scmp.ne.s32.totalorder %s1517_s3, %s1316_s5  ;;  %s54_s28 = int_to_ptr.vmem [resolvable:$true] %s53_s28 }
  0x37   :  { %p1320_p11 = scmp.lt.u32.totalorder %s1316_s5, %s1517_s3 }
  0x39   :  { %p1322_p12 = pnand %p1320_p11, %p1317_p10 }
  0x3b   :  { %1325 = shalt.err (!%p1322_p12)
}
  0x3c   :  { %s1326_s11 = scalar_lea.vmem %s54_s28, 512  ;;  %p1331_p0 = scmp.lt.s32.totalorder %s54_s28, %s54_s28 }
  0x3d   :  { %p1327_p13 = scmp.ne.s32.totalorder %s54_s28, %s1326_s11  ;;  %p1332_p1 = scmp.lt.s32.totalorder %s1326_s11, %s1326_s11 }
  0x3f   :  { %p1333_p2 = por %p1332_p1, %p1331_p0 }
  0x41   :  { %p1334_p3 = pnand %p1333_p2, %p1327_p13 }
  0x43   :  { %1337 = shalt.err (!%p1334_p3)
}
  0x44   :  { %56 = dma.hbm_to_vmem [thread:$0]  %s1517_s3, 512, %s54_s28, [#allocation9]  }
  0x45   :  { %1360 = dma.done.wait [#allocation3], 128  }
  0x46   :  { %1361 = vsyncadd [#allocation3], 4294967168 }
  0x47   :  { %1362 = dma.done.wait [#allocation6], 16384  }
  0x48   :  { %1363 = vsyncadd [#allocation6], 4294950912 }
  0x49   :  { %1364 = dma.done.wait [#allocation9], 512  }
  0x4a   :  { %1365 = vsyncadd [#allocation9], 4294966784  ;;  %v1376_v0 = vmov 0.0   ;;  %v71_v1 = vld [vmem:[#allocation5 + $0x8] sm:$0xff]  ;;  %v73_v3 = vld [vmem:[#allocation5 + $0x18] sm:$0xff]  ;;  %vm102_vm0 = vcmask 523264  }
  0x4b   :  { %170 = vmatprep.mubr.f32.mxu0 %v1376_v0  ;;  %241 = vmatprep.mubr.f32.mxu1 %v1376_v0  ;;  %v75_v2 = vld [vmem:[#allocation5 + $0x28] sm:$0xff]  ;;  %v77_v5 = vld [vmem:[#allocation5 + $0x38] sm:$0xff]  ;;  %v70_v6 = vld [vmem:[#allocation5] sm:$0xff]  ;;  %vm1379_vm1 = vmmov 0   ;;  %s1380_s3 = smov [#allocation10]  }
  0x4c   :  { %v1077_v4 = vpack.c.bf16 %v75_v2, %v71_v1  ;;  %v74_v7 = vld [vmem:[#allocation5 + $0x20] sm:$0xff]  ;;  %v1093_v8 = vpack.c.bf16 %v77_v5, %v73_v3  ;;  %v72_v10 = vld [vmem:[#allocation5 + $0x10] sm:$0xff]  ;;  %v79_v12 = vld [vmem:[#allocation5 + $0x48] sm:$0xff]  ;;  %s890_s12 = sshll.u32 %s1380_s3, 4  ;;  %s891_s12 = int_to_ptr.vmem [resolvable:$true] %s890_s12 }
  0x4d   :  { %v1079_v9 = vpack.c.bf16 %v74_v7, %v70_v6  ;;  %v76_v11 = vld [vmem:[#allocation5 + $0x30] sm:$0xff]  ;;  %v83_v14 = vld [vmem:[#allocation5 + $0x68] sm:$0xff]  ;;  %v81_v15 = vld [vmem:[#allocation5 + $0x58] sm:$0xff]  ;;  %s1338_s13 = scalar_lea.vmem %s891_s12, 128  ;;  %p1343_p5 = scmp.lt.s32.totalorder %s891_s12, %s891_s12 }
  0x4e   :  { %1078 = vmatprep.subr.bf16.mxu0 %v1077_v4  ;;  %v1095_v13 = vpack.c.bf16 %v76_v11, %v72_v10  ;;  %v85_v16 = vld [vmem:[#allocation5 + $0x78] sm:$0xff]  ;;  %1094 = vmatprep.subr.bf16.mxu1 %v1093_v8  ;;  %v1081_v17 = vpack.c.bf16 %v83_v14, %v79_v12  ;;  %v78_v19 = vld [vmem:[#allocation5 + $0x40] sm:$0xff]  ;;  %v80_v21 = vld [vmem:[#allocation5 + $0x50] sm:$0xff]  ;;  %p1339_p4 = scmp.ne.s32.totalorder %s891_s12, %s1338_s13  ;;  %p1344_p6 = scmp.lt.s32.totalorder %s1338_s13, %s1338_s13 }
  0x4f   :  { %1080 = vmatpush1.bf16.msra.mxu0 %v1079_v9  ;;  %v1097_v18 = vpack.c.bf16 %v85_v16, %v81_v15  ;;  %v82_v20 = vld [vmem:[#allocation5 + $0x60] sm:$0xff]  ;;  %v84_v23 = vld [vmem:[#allocation5 + $0x70] sm:$0xff]  ;;  %v87_v24 = vld [vmem:[#allocation5 + $0x88] sm:$0xff] }
  0x50   :  { %1096 = vmatpush1.bf16.msra.mxu1 %v1095_v13  ;;  %v1083_v22 = vpack.c.bf16 %v82_v20, %v78_v19  ;;  %v91_v25 = vld [vmem:[#allocation5 + $0xa8] sm:$0xff]  ;;  %1082 = vmatprep.subr.bf16.mxu0 %v1081_v17  ;;  %v1099_v26 = vpack.c.bf16 %v84_v23, %v80_v21  ;;  %v89_v28 = vld [vmem:[#allocation5 + $0x98] sm:$0xff]  ;;  %v86_v30 = vld [vmem:[#allocation5 + $0x80] sm:$0xff]  ;;  %p1345_p7 = por %p1344_p6, %p1343_p5 }
  0x51   :  { %1098 = vmatprep.subr.bf16.mxu1 %v1097_v18  ;;  %v1085_v27 = vpack.c.bf16 %v91_v25, %v87_v24  ;;  %v93_v29 = vld [vmem:[#allocation5 + $0xb8] sm:$0xff]  ;;  %v90_v32 = vld [vmem:[#allocation5 + $0xa0] sm:$0xff]  ;;  %v88_v33 = vld [vmem:[#allocation5 + $0x90] sm:$0xff] }
  0x52   :  { %v1101_v31 = vpack.c.bf16 %v93_v29, %v89_v28  ;;  %v92_v34 = vld [vmem:[#allocation5 + $0xb0] sm:$0xff]  ;;  %v1087_v35 = vpack.c.bf16 %v90_v32, %v86_v30  ;;  %v95_v36 = vld [vmem:[#allocation5 + $0xc8] sm:$0xff]  ;;  %v97_v38 = vld [vmem:[#allocation5 + $0xd8] sm:$0xff]  ;;  %p1346_p8 = pnand %p1345_p7, %p1339_p4 }
  0x53   :  { %1084 = vmatpush1.bf16.msra.mxu0 %v1083_v22  ;;  %v99_v37 = vld [vmem:[#allocation5 + $0xe8] sm:$0xff]  ;;  %v1103_v39 = vpack.c.bf16 %v92_v34, %v88_v33  ;;  %v101_v41 = vld [vmem:[#allocation5 + $0xf8] sm:$0xff]  ;;  %v94_v42 = vld [vmem:[#allocation5 + $0xc0] sm:$0xff] }
  0x54   :  { %1100 = vmatpush1.bf16.msra.mxu1 %v1099_v26  ;;  %1086 = vmatprep.subr.bf16.mxu0 %v1085_v27  ;;  %v1089_v40 = vpack.c.bf16 %v99_v37, %v95_v36  ;;  %v98_v43 = vld [vmem:[#allocation5 + $0xe0] sm:$0xff]  ;;  %v1105_v44 = vpack.c.bf16 %v101_v41, %v97_v38  ;;  %v96_v45 = vld [vmem:[#allocation5 + $0xd0] sm:$0xff]  ;;  %v69_v49 = vld [vmem:[#allocation2] sm:$0xff] }
  0x55   :  { %1102 = vmatprep.subr.bf16.mxu1 %v1101_v31  ;;  %v100_v46 = vld [vmem:[#allocation5 + $0xf0] sm:$0xff]  ;;  %v1091_v47 = vpack.c.bf16 %v98_v43, %v94_v42  ;;  %v462_v50 = vld [vmem:[#allocation7 + $0x80] sm:$0xff]  ;;  %v463_v51 = vld [vmem:[#allocation7 + $0x88] sm:$0xff] }
  0x56   :  { %v1107_v48 = vpack.c.bf16 %v100_v46, %v96_v45  ;;  %v494_v52 = vld [vmem:[#allocation7 + $0x180] sm:$0xff]  ;;  %v1109_v53 = vpack.c.bf16 %v463_v51, %v462_v50  ;;  %v495_v54 = vld [vmem:[#allocation7 + $0x188] sm:$0xff]  ;;  %v464_v62 = vld [vmem:[#allocation7 + $0x90] sm:$0xff] }
  0x57   :  { %1088 = vmatpush1.bf16.msra.mxu0 %v1087_v35  ;;  %v446_v55 = vld [vmem:[#allocation7] sm:$0xff]  ;;  %v447_v56 = vld [vmem:[#allocation7 + $0x8] sm:$0xff]  ;;  %v1141_v57 = vpack.c.bf16 %v495_v54, %v494_v52  ;;  %v465_v63 = vld [vmem:[#allocation7 + $0x98] sm:$0xff] }
  0x58   :  { %1104 = vmatpush1.bf16.msra.mxu1 %v1103_v39  ;;  %1090 = vmatprep.subr.bf16.mxu0 %v1089_v40  ;;  %v1111_v58 = vpack.c.bf16 %v447_v56, %v446_v55  ;;  %v478_v59 = vld [vmem:[#allocation7 + $0x100] sm:$0xff]  ;;  %v479_v60 = vld [vmem:[#allocation7 + $0x108] sm:$0xff]  ;;  %v496_v1 = vld [vmem:[#allocation7 + $0x190] sm:$0xff]  ;;  %v1113_v2 = vpack.c.bf16 %v465_v63, %v464_v62 }
  0x59   :  { %1106 = vmatprep.subr.bf16.mxu1 %v1105_v44  ;;  %v1143_v61 = vpack.c.bf16 %v479_v60, %v478_v59  ;;  %v497_v3 = vld [vmem:[#allocation7 + $0x198] sm:$0xff]  ;;  %v448_v4 = vld [vmem:[#allocation7 + $0x10] sm:$0xff]  ;;  %v466_v11 = vld [vmem:[#allocation7 + $0xa0] sm:$0xff] }
  0x5a   :  { %v449_v5 = vld [vmem:[#allocation7 + $0x18] sm:$0xff]  ;;  %v1145_v6 = vpack.c.bf16 %v497_v3, %v496_v1  ;;  %v480_v8 = vld [vmem:[#allocation7 + $0x110] sm:$0xff]  ;;  %v467_v12 = vld [vmem:[#allocation7 + $0xa8] sm:$0xff] }
  0x5b   :  { %1092 = vmatpush1.bf16.msra.mxu0 %v1091_v47  ;;  %v1115_v7 = vpack.c.bf16 %v449_v5, %v448_v4  ;;  %v481_v9 = vld [vmem:[#allocation7 + $0x118] sm:$0xff]  ;;  %v498_v13 = vld [vmem:[#allocation7 + $0x1a0] sm:$0xff]  ;;  %v1117_v14 = vpack.c.bf16 %v467_v12, %v466_v11  ;;  %v499_v15 = vld [vmem:[#allocation7 + $0x1a8] sm:$0xff] }
  0x5c   :  { %1108 = vmatpush1.bf16.msra.mxu1 %v1107_v48  ;;  %1110 = vmatprep.subr.bf16.mxu0 %v1109_v53  ;;  %v1147_v10 = vpack.c.bf16 %v481_v9, %v480_v8  ;;  %v450_v16 = vld [vmem:[#allocation7 + $0x20] sm:$0xff]  ;;  %v451_v17 = vld [vmem:[#allocation7 + $0x28] sm:$0xff]  ;;  %v1149_v18 = vpack.c.bf16 %v499_v15, %v498_v13  ;;  %v468_v23 = vld [vmem:[#allocation7 + $0xb0] sm:$0xff] }
  0x5d   :  { %1142 = vmatprep.subr.bf16.mxu1 %v1141_v57  ;;  %v1119_v19 = vpack.c.bf16 %v451_v17, %v450_v16  ;;  %v482_v20 = vld [vmem:[#allocation7 + $0x120] sm:$0xff]  ;;  %v483_v21 = vld [vmem:[#allocation7 + $0x128] sm:$0xff]  ;;  %v469_v24 = vld [vmem:[#allocation7 + $0xb8] sm:$0xff] }
  0x5e   :  { %901 = vmatmul.mubr.msk.f32.vlgmr.msra.gmra.mrb[0].mxu0 %vm102_vm0, %v69_v49  ;;  %v1151_v22 = vpack.c.bf16 %v483_v21, %v482_v20  ;;  %v500_v25 = vld [vmem:[#allocation7 + $0x1b0] sm:$0xff]  ;;  %v1121_v26 = vpack.c.bf16 %v469_v24, %v468_v23  ;;  %v501_v27 = vld [vmem:[#allocation7 + $0x1b8] sm:$0xff]  ;;  %v470_v35 = vld [vmem:[#allocation7 + $0xc0] sm:$0xff] }
  0x5f   :  { %902 = vmatmul.mubr.msk.f32.vlgmr.msra.gmra.mrb[0].mxu1 %vm102_vm0, %v69_v49  ;;  %1112 = vmatpush3.bf16.msra.mxu0 %v1111_v58  ;;  %v452_v28 = vld [vmem:[#allocation7 + $0x30] sm:$0xff]  ;;  %v453_v29 = vld [vmem:[#allocation7 + $0x38] sm:$0xff]  ;;  %v1153_v30 = vpack.c.bf16 %v501_v27, %v500_v25  ;;  %v471_v36 = vld [vmem:[#allocation7 + $0xc8] sm:$0xff] }
  0x60   :  { %1144 = vmatpush3.bf16.msra.mxu1 %v1143_v61  ;;  %1114 = vmatprep.subr.bf16.mxu0 %v1113_v2  ;;  %v1123_v31 = vpack.c.bf16 %v453_v29, %v452_v28  ;;  %v484_v32 = vld [vmem:[#allocation7 + $0x130] sm:$0xff]  ;;  %v485_v33 = vld [vmem:[#allocation7 + $0x138] sm:$0xff]  ;;  %v502_v37 = vld [vmem:[#allocation7 + $0x1c0] sm:$0xff]  ;;  %v1125_v38 = vpack.c.bf16 %v471_v36, %v470_v35 }
  0x61   :  { %1146 = vmatprep.subr.bf16.mxu1 %v1145_v6  ;;  %v1155_v34 = vpack.c.bf16 %v485_v33, %v484_v32  ;;  %v503_v39 = vld [vmem:[#allocation7 + $0x1c8] sm:$0xff]  ;;  %v454_v40 = vld [vmem:[#allocation7 + $0x40] sm:$0xff]  ;;  %v472_v47 = vld [vmem:[#allocation7 + $0xd0] sm:$0xff] }
  0x62   :  { %v455_v41 = vld [vmem:[#allocation7 + $0x48] sm:$0xff]  ;;  %v1157_v42 = vpack.c.bf16 %v503_v39, %v502_v37  ;;  %v486_v44 = vld [vmem:[#allocation7 + $0x140] sm:$0xff]  ;;  %v473_v48 = vld [vmem:[#allocation7 + $0xd8] sm:$0xff] }
  0x63   :  { %1116 = vmatpush3.bf16.msra.mxu0 %v1115_v7  ;;  %v1127_v43 = vpack.c.bf16 %v455_v41, %v454_v40  ;;  %v487_v45 = vld [vmem:[#allocation7 + $0x148] sm:$0xff]  ;;  %v504_v49 = vld [vmem:[#allocation7 + $0x1d0] sm:$0xff]  ;;  %v1129_v50 = vpack.c.bf16 %v473_v48, %v472_v47  ;;  %v505_v51 = vld [vmem:[#allocation7 + $0x1d8] sm:$0xff] }
  0x64   :  { %1148 = vmatpush3.bf16.msra.mxu1 %v1147_v10  ;;  %1118 = vmatprep.subr.bf16.mxu0 %v1117_v14  ;;  %v1159_v46 = vpack.c.bf16 %v487_v45, %v486_v44  ;;  %v456_v52 = vld [vmem:[#allocation7 + $0x50] sm:$0xff]  ;;  %v457_v53 = vld [vmem:[#allocation7 + $0x58] sm:$0xff]  ;;  %v1161_v54 = vpack.c.bf16 %v505_v51, %v504_v49  ;;  %v474_v58 = vld [vmem:[#allocation7 + $0xe0] sm:$0xff] }
  0x65   :  { %1150 = vmatprep.subr.bf16.mxu1 %v1149_v18  ;;  %v1131_v55 = vpack.c.bf16 %v457_v53, %v456_v52  ;;  %v488_v56 = vld [vmem:[#allocation7 + $0x150] sm:$0xff]  ;;  %v489_v57 = vld [vmem:[#allocation7 + $0x158] sm:$0xff]  ;;  %v475_v60 = vld [vmem:[#allocation7 + $0xe8] sm:$0xff] }
  0x66   :  { %v1163_v59 = vpack.c.bf16 %v489_v57, %v488_v56  ;;  %v506_v61 = vld [vmem:[#allocation7 + $0x1e0] sm:$0xff]  ;;  %v507_v62 = vld [vmem:[#allocation7 + $0x1e8] sm:$0xff]  ;;  %v1133_v63 = vpack.c.bf16 %v475_v60, %v474_v58  ;;  %v476_v7 = vld [vmem:[#allocation7 + $0xf0] sm:$0xff] }
  0x67   :  { %1120 = vmatpush3.bf16.msra.mxu0 %v1119_v19  ;;  %v1165_v1 = vpack.c.bf16 %v507_v62, %v506_v61  ;;  %v458_v2 = vld [vmem:[#allocation7 + $0x60] sm:$0xff]  ;;  %v459_v3 = vld [vmem:[#allocation7 + $0x68] sm:$0xff]  ;;  %v477_v8 = vld [vmem:[#allocation7 + $0xf8] sm:$0xff] }
  0x68   :  { %1152 = vmatpush3.bf16.msra.mxu1 %v1151_v22  ;;  %1122 = vmatprep.subr.bf16.mxu0 %v1121_v26  ;;  %v490_v4 = vld [vmem:[#allocation7 + $0x160] sm:$0xff]  ;;  %v1135_v5 = vpack.c.bf16 %v459_v3, %v458_v2  ;;  %v491_v6 = vld [vmem:[#allocation7 + $0x168] sm:$0xff]  ;;  %v1137_v10 = vpack.c.bf16 %v477_v8, %v476_v7  ;;  %v508_v11 = vld [vmem:[#allocation7 + $0x1f0] sm:$0xff] }
  0x69   :  { %1154 = vmatprep.subr.bf16.mxu1 %v1153_v30  ;;  %v1167_v9 = vpack.c.bf16 %v491_v6, %v490_v4  ;;  %v509_v12 = vld [vmem:[#allocation7 + $0x1f8] sm:$0xff]  ;;  %v460_v13 = vld [vmem:[#allocation7 + $0x70] sm:$0xff] }
  0x6a   :  { %v1169_v14 = vpack.c.bf16 %v509_v12, %v508_v11  ;;  %v461_v15 = vld [vmem:[#allocation7 + $0x78] sm:$0xff]  ;;  %v492_v16 = vld [vmem:[#allocation7 + $0x170] sm:$0xff] }
  0x6b   :  { %1124 = vmatpush3.bf16.msra.mxu0 %v1123_v31  ;;  %v493_v17 = vld [vmem:[#allocation7 + $0x178] sm:$0xff]  ;;  %v1139_v18 = vpack.c.bf16 %v461_v15, %v460_v13 }
  0x6c   :  { %1156 = vmatpush3.bf16.msra.mxu1 %v1155_v34  ;;  %1126 = vmatprep.subr.bf16.mxu0 %v1125_v38  ;;  %v1171_v19 = vpack.c.bf16 %v493_v17, %v492_v16 }
  0x6d   :  { %1158 = vmatprep.subr.bf16.mxu1 %v1157_v42 }
  0x6f   :  { %1128 = vmatpush3.bf16.msra.mxu0 %v1127_v43 }
  0x70   :  { %1160 = vmatpush3.bf16.msra.mxu1 %v1159_v46  ;;  %1130 = vmatprep.subr.bf16.mxu0 %v1129_v50 }
  0x71   :  { %1162 = vmatprep.subr.bf16.mxu1 %v1161_v54 }
  0x73   :  { %1132 = vmatpush3.bf16.msra.mxu0 %v1131_v55 }
  0x74   :  { %1164 = vmatpush3.bf16.msra.mxu1 %v1163_v59  ;;  %1134 = vmatprep.subr.bf16.mxu0 %v1133_v63 }
  0x75   :  { %1166 = vmatprep.subr.bf16.mxu1 %v1165_v1 }
  0x77   :  { %1136 = vmatpush3.bf16.msra.mxu0 %v1135_v5 }
  0x78   :  { %1168 = vmatpush3.bf16.msra.mxu1 %v1167_v9  ;;  %1138 = vmatprep.subr.bf16.mxu0 %v1137_v10 }
  0x79   :  { %1170 = vmatprep.subr.bf16.mxu1 %v1169_v14 }
  0x7b   :  { %1140 = vmatpush3.bf16.msra.mxu0 %v1139_v18 }
  0x7c   :  { %1172 = vmatpush3.bf16.msra.mxu1 %v1171_v19 }
 0x131   :  { %v1456_v20 = vpop.f32.mrb[0].mxu0 }
 0x132   :  { %v251_v21 = vrot.slane %v1456_v20, 4  ;;  %v280_v22 = vmul.f32 %v1456_v20, %v1456_v20  ;;  %v1461_v23 = vpop.f32.mrb[0].mxu1  ;;  %v1463_v24 = vpop.f32.mrb[1].mxu0 }
 0x133   :  { %v263_v25 = vrot.slane %v1461_v23, 4  ;;  %v282_v26 = vmul.f32 %v1461_v23, %v1461_v23  ;;  %v257_v27 = vrot.slane %v1463_v24, 4  ;;  %v281_v28 = vmul.f32 %v1463_v24, %v1463_v24  ;;  %v1471_v29 = vpop.f32.mrb[1].mxu1 }
 0x134   :  { %v252_v30 = vadd.f32 %v251_v21, %v1456_v20  ;;  %v284_v31 = vrot.slane %v280_v22, 4  ;;  %v269_v32 = vrot.slane %v1471_v29, 4  ;;  %v283_v33 = vmul.f32 %v1471_v29, %v1471_v29 }
 0x135   :  { %v264_v34 = vadd.f32 %v263_v25, %v1461_v23  ;;  %v296_v35 = vrot.slane %v282_v26, 4  ;;  %v258_v36 = vadd.f32 %v257_v27, %v1463_v24  ;;  %v290_v37 = vrot.slane %v281_v28, 4 }
 0x136   :  { %v253_v38 = vrot.slane %v252_v30, 2  ;;  %v285_v39 = vadd.f32 %v284_v31, %v280_v22  ;;  %v270_v40 = vadd.f32 %v269_v32, %v1471_v29  ;;  %v302_v41 = vrot.slane %v283_v33, 4 }
 0x137   :  { %v265_v42 = vrot.slane %v264_v34, 2  ;;  %v297_v43 = vadd.f32 %v296_v35, %v282_v26  ;;  %v259_v44 = vrot.slane %v258_v36, 2  ;;  %v291_v45 = vadd.f32 %v290_v37, %v281_v28 }
 0x138   :  { %v254_v46 = vadd.f32 %v253_v38, %v252_v30  ;;  %v286_v47 = vrot.slane %v285_v39, 2  ;;  %v271_v48 = vrot.slane %v270_v40, 2  ;;  %v303_v49 = vadd.f32 %v302_v41, %v283_v33 }
 0x139   :  { %v266_v50 = vadd.f32 %v265_v42, %v264_v34  ;;  %v298_v51 = vrot.slane %v297_v43, 2  ;;  %v260_v52 = vadd.f32 %v259_v44, %v258_v36  ;;  %v292_v53 = vrot.slane %v291_v45, 2 }
 0x13a   :  { %v255_v54 = vrot.slane %v254_v46, 1  ;;  %v287_v55 = vadd.f32 %v286_v47, %v285_v39  ;;  %v272_v56 = vadd.f32 %v271_v48, %v270_v40  ;;  %v304_v57 = vrot.slane %v303_v49, 2 }
 0x13b   :  { %v267_v58 = vrot.slane %v266_v50, 1  ;;  %v299_v59 = vadd.f32 %v298_v51, %v297_v43  ;;  %v261_v60 = vrot.slane %v260_v52, 1  ;;  %v293_v61 = vadd.f32 %v292_v53, %v291_v45 }
 0x13c   :  { %v256_v62 = vadd.f32 %v255_v54, %v254_v46  ;;  %v288_v63 = vrot.slane %v287_v55, 1  ;;  %v273_v1 = vrot.slane %v272_v56, 1  ;;  %v305_v2 = vadd.f32 %v304_v57, %v303_v49 }
 0x13d   :  { %v268_v3 = vadd.f32 %v267_v58, %v266_v50  ;;  %v300_v4 = vrot.slane %v299_v59, 1  ;;  %v262_v5 = vadd.f32 %v261_v60, %v260_v52  ;;  %v294_v6 = vrot.slane %v293_v61, 1  ;;  %v248_v52 = vld [vmem:[#allocation8] ss:$8 sm:$0xf] }
 0x13e   :  { %v276_v7 = vmul.f32 0.125, %v256_v62  ;;  %v289_v8 = vadd.f32 %v288_v63, %v287_v55  ;;  %v274_v9 = vadd.f32 %v273_v1, %v272_v56  ;;  %v306_v10 = vrot.slane %v305_v2, 1 }
 0x13f   :  { %v278_v11 = vmul.f32 0.125, %v268_v3  ;;  %v301_v12 = vadd.f32 %v300_v4, %v299_v59  ;;  %v277_v13 = vmul.f32 0.125, %v262_v5  ;;  %v295_v14 = vadd.f32 %v294_v6, %v293_v61 }
 0x140   :  { %v308_v15 = vmul.f32 0.125, %v289_v8  ;;  %v312_v16 = vmul.f32 %v276_v7, %v276_v7  ;;  %v279_v17 = vmul.f32 0.125, %v274_v9  ;;  %v307_v18 = vadd.f32 %v306_v10, %v305_v2 }
 0x141   :  { %v310_v19 = vmul.f32 0.125, %v301_v12  ;;  %v314_v21 = vmul.f32 %v278_v11, %v278_v11  ;;  %v309_v22 = vmul.f32 0.125, %v295_v14  ;;  %v313_v25 = vmul.f32 %v277_v13, %v277_v13 }
 0x142   :  { %v316_v26 = vsub.f32 %v308_v15, %v312_v16  ;;  %v311_v27 = vmul.f32 0.125, %v307_v18  ;;  %v315_v28 = vmul.f32 %v279_v17, %v279_v17  ;;  %v1377_v37 = vmov 1966171168   ;;  %v250_v16 = vld [vmem:[#allocation8 + $0x1] ss:$8 sm:$0xf] }
 0x143   :  { %v318_v30 = vsub.f32 %v310_v19, %v314_v21  ;;  %v317_v31 = vsub.f32 %v309_v22, %v313_v25  ;;  %v335_v38 = vunpack.c.l.s4 %v1377_v37  ;;  %v337_v39 = vlaneseq }
 0x144   :  { %v320_v32 = vadd.f32 1e-05, %v316_v26  ;;  %v319_v33 = vsub.f32 %v311_v27, %v315_v28  ;;  %v677_v27 = vld [vmem:[#allocation7 + $0x200] sm:$0xff]  ;;  %v678_v28 = vld [vmem:[#allocation7 + $0x208] sm:$0xff] }
 0x145   :  { %v322_v34 = vadd.f32 1e-05, %v318_v30  ;;  %v321_v35 = vadd.f32 1e-05, %v317_v31  ;;  %v336_v40 = vunpack.c.0.s8 %v335_v38  ;;  %v338_v41 = vshrl.u32 %v337_v39, 7  ;;  %v683_v38 = vld [vmem:[#allocation7 + $0x230] sm:$0xff] }
 0x146   :  { %1234 = vrsqrt.f32 %v320_v32  ;;  %v323_v36 = vadd.f32 1e-05, %v319_v33  ;;  %v1174_v30 = vpack.c.bf16 %v678_v28, %v677_v27  ;;  %v1378_v31 = vmov 0.0|0.0   ;;  %v679_v32 = vld [vmem:[#allocation7 + $0x210] sm:$0xff]  ;;  %v680_v33 = vld [vmem:[#allocation7 + $0x218] sm:$0xff]  ;;  %v794_v28 = vld [vmem:[#allocation7 + $0x2a0] sm:$0xff] }
 0x147   :  { %1236 = vrsqrt.f32 %v322_v34  ;;  %v339_v44 = vsub.s32 %v336_v40, %v338_v41  ;;  %v369_v53 = vsub.s32 2, %v338_v41  ;;  %v373_v55 = vsub.s32 3, %v338_v41  ;;  %1173 = vmatprep.subr.bf16.mxu0 %v1378_v31  ;;  %1197 = vmatprep.subr.bf16.mxu1 %v1378_v31  ;;  %v684_v39 = vld [vmem:[#allocation7 + $0x238] sm:$0xff] }
 0x148   :  { %1238 = vrsqrt.f32 %v321_v35  ;;  %v361_v56 = vsub.s32 0, %v338_v41  ;;  %v365_v57 = vsub.s32 1, %v338_v41  ;;  %v1177_v34 = vpack.c.bf16 %v680_v33, %v679_v32  ;;  %v681_v35 = vld [vmem:[#allocation7 + $0x220] sm:$0xff]  ;;  %v796_v33 = vld [vmem:[#allocation7 + $0x2b0] sm:$0xff] }
 0x149   :  { %1240 = vrsqrt.f32 %v323_v36  ;;  %v682_v36 = vld [vmem:[#allocation7 + $0x228] sm:$0xff]  ;;  %v1183_v40 = vpack.c.bf16 %v684_v39, %v683_v38  ;;  %v685_v41 = vld [vmem:[#allocation7 + $0x240] sm:$0xff]  ;;  %v800_v39 = vld [vmem:[#allocation7 + $0x2d0] sm:$0xff] }
 0x14a   :  { %v1180_v37 = vpack.c.bf16 %v682_v36, %v681_v35  ;;  %v798_v36 = vld [vmem:[#allocation7 + $0x2c0] sm:$0xff] }
 0x150   :  { %v1235_v42 = vpop.eup %1234 }
 0x151   :  { %v1237_v43 = vpop.eup %1236 }
 0x152   :  { %v1239_v45 = vpop.eup %1238 }
 0x153   :  { %v1241_v46 = vpop.eup %1240  ;;  %v332_v47 = vcombine.low %v1235_v42, %v1239_v45  ;;  %v686_v42 = vld [vmem:[#allocation7 + $0x248] sm:$0xff]  ;;  %v688_v45 = vld [vmem:[#allocation7 + $0x258] sm:$0xff] }
 0x154   :  { %v333_v48 = vcombine.low %v1237_v43, %v1241_v46  ;;  %v1186_v43 = vpack.c.bf16 %v686_v42, %v685_v41  ;;  %v802_v42 = vld [vmem:[#allocation7 + $0x2e0] sm:$0xff] }
 0x155   :  { %v340_v49 = vrot.slane %v332_v47, %v339_v44  ;;  %v689_v47 = vld [vmem:[#allocation7 + $0x260] sm:$0xff] }
 0x156   :  { %v347_v50 = vrot.slane %v333_v48, %v339_v44  ;;  %v690_v48 = vld [vmem:[#allocation7 + $0x268] sm:$0xff] }
 0x158   :  { %v348_v51 = vcombine.low %v340_v49, %v347_v50  ;;  %v691_v49 = vld [vmem:[#allocation7 + $0x270] sm:$0xff]  ;;  %v692_v50 = vld [vmem:[#allocation7 + $0x278] sm:$0xff] }
 0x15a   :  { %v355_v54 = vrot.slane %v348_v51, %v339_v44  ;;  %v1195_v51 = vpack.c.bf16 %v692_v50, %v691_v49 }
 0x15c   :  { %v357_v58 = vmul.f32 %v355_v54, %v248_v52 }
 0x15e   :  { %v370_v59 = vrot.slane %v357_v58, %v369_v53  ;;  %v374_v60 = vrot.slane %v357_v58, %v373_v55  ;;  %v362_v61 = vrot.slane %v357_v58, %v361_v56  ;;  %v366_v62 = vrot.slane %v357_v58, %v365_v57 }
 0x160   :  { %v381_v63 = vmul.f32 %v370_v59, %v278_v11  ;;  %v382_v1 = vmul.f32 %v374_v60, %v279_v17  ;;  %v416_v2 = vmul.f32 %v374_v60, %v1471_v29  ;;  %v379_v3 = vmul.f32 %v362_v61, %v276_v7 }
 0x161   :  { %v380_v4 = vmul.f32 %v366_v62, %v277_v13  ;;  %v414_v5 = vmul.f32 %v366_v62, %v1463_v24  ;;  %v413_v6 = vmul.f32 %v362_v61, %v1456_v20  ;;  %v415_v8 = vmul.f32 %v370_v59, %v1461_v23 }
 0x162   :  { %v388_v9 = vcombine.low %v381_v63, %v382_v1 }
 0x163   :  { %v387_v10 = vcombine.low %v379_v3, %v380_v4 }
 0x164   :  { %v402_v12 = vrot.slane %v388_v9, %v339_v44 }
 0x165   :  { %v395_v14 = vrot.slane %v387_v10, %v339_v44 }
 0x167   :  { %v403_v15 = vcombine.low %v395_v14, %v402_v12 }
 0x169   :  { %v410_v18 = vrot.slane %v403_v15, %v339_v44  ;;  %v687_v44 = vld [vmem:[#allocation7 + $0x250] sm:$0xff] }
 0x16a   :  { %v1189_v46 = vpack.c.bf16 %v688_v45, %v687_v44  ;;  %v804_v45 = vld [vmem:[#allocation7 + $0x2f0] sm:$0xff] }
 0x16b   :  { %v412_v19 = vsub.f32 %v250_v16, %v410_v18  ;;  %v650_v18 = vld [vmem:[#allocation8 + $0x2] ss:$0 sm:$0xff] }
 0x16d   :  { %v425_v11 = vrot.slane %v412_v19, %v365_v57  ;;  %v433_v17 = vrot.slane %v412_v19, %v373_v55  ;;  %v421_v21 = vrot.slane %v412_v19, %v361_v56  ;;  %v429_v29 = vrot.slane %v412_v19, %v369_v53 }
 0x16f   :  { %v439_v7 = vadd.f32 %v425_v11, %v414_v5  ;;  %v441_v13 = vadd.f32 %v433_v17, %v416_v2  ;;  %v438_v22 = vadd.f32 %v421_v21, %v413_v6  ;;  %v440_v24 = vadd.f32 %v429_v29, %v415_v8  ;;  %v651_v17 = vld [vmem:[#allocation8 + $0x3] ss:$0 sm:$0xff] }
 0x171   :  { %v443_v25 = vmax.f32 %v439_v7, 0.0  ;;  %v445_v20 = vmax.f32 %v441_v13, 0.0  ;;  %v442_v26 = vmax.f32 %v438_v22, 0.0  ;;  %v444_v23 = vmax.f32 %v440_v24, 0.0  ;;  %v790_v24 = vld [vmem:[#allocation7 + $0x280] sm:$0xff] }
 0x173   :  { %574 = vmatprep.mubr.f32.mxu0 %v443_v25  ;;  %644 = vmatprep.mubr.f32.mxu1 %v445_v20  ;;  %v791_v25 = vld [vmem:[#allocation7 + $0x288] sm:$0xff] }
 0x174   :  { %575 = vmatmul.mubr.f32.vlgmr.msra.gmra.mrb[2].mxu0 %v442_v26  ;;  %645 = vmatmul.mubr.f32.vlgmr.msra.gmra.mrb[2].mxu1 %v444_v23  ;;  %v1198_v20 = vpack.c.bf16 %v791_v25, %v790_v24  ;;  %v792_v26 = vld [vmem:[#allocation7 + $0x290] sm:$0xff]  ;;  %v793_v23 = vld [vmem:[#allocation7 + $0x298] sm:$0xff] }
 0x175   :  { %1175 = vmatpush3.bf16.msra.mxu0 %v1174_v30  ;;  %1039 = vmatprep.mubr.msk.f32.mxu0 %vm1379_vm1, %v1376_v0  ;;  %v1201_v27 = vpack.c.bf16 %v793_v23, %v792_v26  ;;  %v795_v30 = vld [vmem:[#allocation7 + $0x2a8] sm:$0xff] }
 0x176   :  { %1176 = vmatprep.subr.bf16.mxu0 %v1378_v31  ;;  %1074 = vmatprep.mubr.msk.f32.mxu1 %vm1379_vm1, %v1376_v0  ;;  %v1192_v0 = vpack.c.bf16 %v690_v48, %v689_v47  ;;  %v1204_v32 = vpack.c.bf16 %v795_v30, %v794_v28 }
 0x177   :  { %1199 = vmatpush3.bf16.msra.mxu1 %v1198_v20 }
 0x178   :  { %1200 = vmatprep.subr.bf16.mxu1 %v1378_v31 }
 0x179   :  { %1178 = vmatpush3.bf16.msra.mxu0 %v1177_v34  ;;  %v797_v34 = vld [vmem:[#allocation7 + $0x2b8] sm:$0xff] }
 0x17a   :  { %1179 = vmatprep.subr.bf16.mxu0 %v1378_v31  ;;  %v1207_v35 = vpack.c.bf16 %v797_v34, %v796_v33 }
 0x17b   :  { %1202 = vmatpush3.bf16.msra.mxu1 %v1201_v27 }
 0x17c   :  { %1203 = vmatprep.subr.bf16.mxu1 %v1378_v31 }
 0x17d   :  { %1181 = vmatpush3.bf16.msra.mxu0 %v1180_v37  ;;  %v799_v37 = vld [vmem:[#allocation7 + $0x2c8] sm:$0xff] }
 0x17e   :  { %1182 = vmatprep.subr.bf16.mxu0 %v1378_v31  ;;  %v1210_v38 = vpack.c.bf16 %v799_v37, %v798_v36 }
 0x17f   :  { %1205 = vmatpush3.bf16.msra.mxu1 %v1204_v32 }
 0x180   :  { %1206 = vmatprep.subr.bf16.mxu1 %v1378_v31 }
 0x181   :  { %1184 = vmatpush3.bf16.msra.mxu0 %v1183_v40  ;;  %v801_v40 = vld [vmem:[#allocation7 + $0x2d8] sm:$0xff] }
 0x182   :  { %1185 = vmatprep.subr.bf16.mxu0 %v1378_v31  ;;  %v1213_v41 = vpack.c.bf16 %v801_v40, %v800_v39 }
 0x183   :  { %1208 = vmatpush3.bf16.msra.mxu1 %v1207_v35 }
 0x184   :  { %1209 = vmatprep.subr.bf16.mxu1 %v1378_v31 }
 0x185   :  { %1187 = vmatpush3.bf16.msra.mxu0 %v1186_v43  ;;  %v803_v43 = vld [vmem:[#allocation7 + $0x2e8] sm:$0xff] }
 0x186   :  { %1188 = vmatprep.subr.bf16.mxu0 %v1378_v31  ;;  %v1216_v44 = vpack.c.bf16 %v803_v43, %v802_v42 }
 0x187   :  { %1211 = vmatpush3.bf16.msra.mxu1 %v1210_v38 }
 0x188   :  { %1212 = vmatprep.subr.bf16.mxu1 %v1378_v31 }
 0x189   :  { %1190 = vmatpush3.bf16.msra.mxu0 %v1189_v46  ;;  %v805_v46 = vld [vmem:[#allocation7 + $0x2f8] sm:$0xff] }
 0x18a   :  { %1191 = vmatprep.subr.bf16.mxu0 %v1378_v31  ;;  %v1219_v47 = vpack.c.bf16 %v805_v46, %v804_v45 }
 0x18b   :  { %1214 = vmatpush3.bf16.msra.mxu1 %v1213_v41 }
 0x18c   :  { %1215 = vmatprep.subr.bf16.mxu1 %v1378_v31 }
 0x18d   :  { %1193 = vmatpush3.bf16.msra.mxu0 %v1192_v0 }
 0x18e   :  { %1194 = vmatprep.subr.bf16.mxu0 %v1378_v31 }
 0x18f   :  { %1217 = vmatpush3.bf16.msra.mxu1 %v1216_v44 }
 0x190   :  { %1218 = vmatprep.subr.bf16.mxu1 %v1378_v31 }
 0x191   :  { %1196 = vmatpush3.bf16.msra.mxu0 %v1195_v51 }
 0x193   :  { %1220 = vmatpush3.bf16.msra.mxu1 %v1219_v47 }
 0x247   :  { %v935_v52 = vpop.f32.mrb[2].mxu0  ;;  %v970_v53 = vpop.f32.mrb[2].mxu1 }
 0x248   :  { %v936_v54 = vpop.f32.mrb[3].mxu0  ;;  %v971_v55 = vpop.f32.mrb[3].mxu1 }
 0x249   :  { %v937_v56 = vadd.f32 %v936_v54, %v935_v52  ;;  %v972_v57 = vadd.f32 %v971_v55, %v970_v53 }
 0x24b   :  { %v647_v58 = vadd.f32 %v972_v57, %v937_v56 }
 0x24d   :  { %v652_v59 = vrot.slane %v647_v58, 4  ;;  %v659_v60 = vmul.f32 %v647_v58, %v647_v58 }
 0x24f   :  { %v653_v61 = vadd.f32 %v652_v59, %v647_v58  ;;  %v660_v62 = vrot.slane %v659_v60, 4 }
 0x251   :  { %v654_v63 = vrot.slane %v653_v61, 2  ;;  %v661_v1 = vadd.f32 %v660_v62, %v659_v60 }
 0x253   :  { %v655_v2 = vadd.f32 %v654_v63, %v653_v61  ;;  %v662_v3 = vrot.slane %v661_v1, 2 }
 0x255   :  { %v656_v4 = vrot.slane %v655_v2, 1  ;;  %v663_v5 = vadd.f32 %v662_v3, %v661_v1  ;;  %v763_v3 = vld [vmem:[#allocation8 + $0x4] ss:$0 sm:$0xff] }
 0x257   :  { %v664_v6 = vrot.slane %v663_v5, 1  ;;  %v657_v8 = vadd.f32 %v656_v4, %v655_v2 }
 0x259   :  { %v665_v9 = vadd.f32 %v664_v6, %v663_v5  ;;  %v658_v10 = vmul.f32 0.125, %v657_v8  ;;  %v764_v6 = vld [vmem:[#allocation8 + $0x5] ss:$0 sm:$0xff] }
 0x25b   :  { %v666_v12 = vmul.f32 0.125, %v665_v9  ;;  %v667_v14 = vmul.f32 %v658_v10, %v658_v10 }
 0x25d   :  { %v668_v15 = vsub.f32 %v666_v12, %v667_v14 }
 0x25f   :  { %v669_v16 = vadd.f32 1e-05, %v668_v15  ;;  %v806_v15 = vld [vmem:[#allocation8 + $0x6] ss:$0 sm:$0xff] }
 0x261   :  { %1242 = vrsqrt.f32 %v669_v16 }
 0x26b   :  { %v1243_v19 = vpop.eup %1242 }
 0x26c   :  { %v671_v11 = vmul.f32 %v1243_v19, %v650_v18 }
 0x26e   :  { %v672_v21 = vmul.f32 %v671_v11, %v658_v10  ;;  %v674_v7 = vmul.f32 %v671_v11, %v647_v58 }
 0x270   :  { %v673_v29 = vsub.f32 %v651_v17, %v672_v21 }
 0x272   :  { %v675_v13 = vadd.f32 %v674_v7, %v673_v29 }
 0x274   :  { %v676_v22 = vmax.f32 %v675_v13, 0.0 }
 0x276   :  { %1040 = vmatmul.mubr.f32.vlgmr.msra.gmra.mrb[4].mxu0 %v676_v22 }
 0x349   :  { %v759_v48 = vpop.f32.mrb[4].mxu0 }
 0x34a   :  { %v765_v0 = vrot.slane %v759_v48, 4  ;;  %v772_v49 = vmul.f32 %v759_v48, %v759_v48  ;;  %v1041_v50 = vpop.f32.mrb[5].mxu0 }
 0x34c   :  { %v766_v51 = vadd.f32 %v765_v0, %v759_v48  ;;  %v773_v52 = vrot.slane %v772_v49, 4 }
 0x34e   :  { %v767_v53 = vrot.slane %v766_v51, 2  ;;  %v774_v54 = vadd.f32 %v773_v52, %v772_v49 }
 0x350   :  { %v768_v55 = vadd.f32 %v767_v53, %v766_v51  ;;  %v775_v56 = vrot.slane %v774_v54, 2 }
 0x352   :  { %v769_v57 = vrot.slane %v768_v55, 1  ;;  %v776_v58 = vadd.f32 %v775_v56, %v774_v54 }
 0x354   :  { %v770_v59 = vadd.f32 %v769_v57, %v768_v55  ;;  %v777_v60 = vrot.slane %v776_v58, 1 }
 0x356   :  { %v771_v61 = vmul.f32 0.125, %v770_v59  ;;  %v778_v31 = vadd.f32 %v777_v60, %v776_v58 }
 0x358   :  { %v779_v62 = vmul.f32 0.125, %v778_v31  ;;  %v780_v63 = vmul.f32 %v771_v61, %v771_v61 }
 0x35a   :  { %v781_v1 = vsub.f32 %v779_v62, %v780_v63 }
 0x35c   :  { %v782_v2 = vadd.f32 1e-05, %v781_v1 }
 0x35e   :  { %1244 = vrsqrt.f32 %v782_v2 }
 0x368   :  { %v1245_v4 = vpop.eup %1244 }
 0x369   :  { %v784_v5 = vmul.f32 %v1245_v4, %v763_v3 }
 0x36b   :  { %v785_v8 = vmul.f32 %v784_v5, %v771_v61  ;;  %v787_v10 = vmul.f32 %v784_v5, %v759_v48 }
 0x36d   :  { %v786_v9 = vsub.f32 %v764_v6, %v785_v8 }
 0x36f   :  { %v788_v12 = vadd.f32 %v787_v10, %v786_v9 }
 0x371   :  { %v789_v14 = vmax.f32 %v788_v12, 0.0 }
 0x373   :  { %1075 = vmatmul.mubr.f32.vlgmr.msra.gmra.mrb[4].mxu1 %v789_v14 }
 0x446   :  { %v873_v16 = vpop.f32.mrb[4].mxu1 }
 0x447   :  { %v874_v18 = vadd.f32 %v873_v16, %v806_v15  ;;  %v1076_v19 = vpop.f32.mrb[5].mxu1 }
 0x449   :  { %v877_v11 = vsub.f32 0.0, %v874_v18 }
 0x44b   :  { %v878_v17 = vmul.f32 1.442695, %v877_v11 }
 0x44d   :  { %1246 = vpow2.f32 %v878_v17 }
 0x457   :  { %v1247_v21 = vpop.eup %1246 }
 0x458   :  { %v880_v29 = vadd.f32 1.0, %v1247_v21 }
 0x45a   :  { %1248 = vrcp.f32 %v880_v29 }
 0x464   :  { %v1249_v7 = vpop.eup %1248 }
 0x465   :  { %883 = vst [vmem:[#allocation10] sm:$0xff] %v1249_v7 }
 0x466   :  { %1349 = shalt.err (!%p1346_p8)
}
 0x467   :  { %s1350_s15 = scalar_lea.hbm %s1518_s4, 128 }
 0x468   :  { %p1351_p9 = scmp.ne.s32.totalorder %s1518_s4, %s1350_s15  ;;  %p1354_p10 = scmp.lt.u32.totalorder %s1350_s15, %s1518_s4 }
 0x46a   :  { %p1356_p11 = pnand %p1354_p10, %p1351_p9 }
 0x46c   :  { %1359 = shalt.err (!%p1356_p11)
}
 0x46d   :  { %893 = dma.vmem_to_hbm [thread:$0]  %s891_s12, 128, %s1518_s4, [#allocation4]  }
 0x46e   :  { %1366 = dma.done.wait [#allocation4], 128  }
 0x46f   :  { %1367 = vsyncadd [#allocation4], 4294967168 }
 0x470   :  { %897 = vsyncpa [#allocation3], 1 }
 0x471   :  { %898 = vsyncpa [#allocation6], 1 }
 0x472   :  { %899 = vsyncpa [#allocation9], 1 }
 0x473   :  { %900 = vsyncpa [#allocation4], 1 }

</bundles_post_ra>
